<compile_context>
chip_gen: v5e
topology: v5e:2x2
jax: 0.10.0
libtpu: 0.0.40
codegen_flags: <defaults>
</compile_context>

<pallas_src>
import jax
import jax.numpy as jnp
from jax.experimental import pallas as pl
from jax.experimental.pallas import tpu as pltpu


def _mf_dot_kernel(u_ref, i_ref, o_ref):
    # u_ref, i_ref: (E, TB) VMEM tiles -- emb dim on sublanes, batch on lanes.
    # o_ref: (1, TB) lane-dense per-pair dot products (float32).
    prod = u_ref[...].astype(jnp.float32) * i_ref[...].astype(jnp.float32)
    o_ref[...] = jnp.sum(prod, axis=0, keepdims=True)


def mf_forward_t(user_emb_t, item_emb_t, user, item, *, tb=8192,
                 vmem_budget_bytes=20 * 1024 * 1024):
    """score[b] = sum_e user_emb_t[e, user[b]] * item_emb_t[e, item[b]] (f32).

    Tables are stored pre-transposed, (E, num_users) / (E, num_items), so the
    gather produces the batch-along-lanes (E, B) layout the kernel consumes
    directly -- no per-call transpose and no padding copy.  The Pallas kernel
    does the elementwise product + reduction over the embedding (sublane) dim.
    Works with f32 or bf16 tables (f32 upcast + f32 accumulation in-kernel).
    """
    E, _ = user_emb_t.shape
    B = int(user.shape[0])

    # Gathered activations already in (E, B): emb dim on sublanes, batch lanes.
    ut = jnp.take(user_emb_t, user, axis=1)   # (E, B)
    it = jnp.take(item_emb_t, item, axis=1)   # (E, B)
    itemsize = jnp.dtype(ut.dtype).itemsize

    # ---- batch tile -------------------------------------------------------
    # Lane-aligned; sized so the two double-buffered (E, TB) input tiles stay
    # inside `vmem_budget_bytes`.  For B < 128 use a single full-extent block.
    if B <= 128:
        tb_eff = B
    else:
        bytes_per_col = 2 * 2 * E * itemsize          # 2 inputs x double buffer
        tb_budget = max(128, (vmem_budget_bytes // bytes_per_col) // 128 * 128)
        tb_eff = max(128, (min(tb, tb_budget) // 128) * 128)
        tb_eff = min(tb_eff, (B // 128) * 128)        # block never exceeds B
    grid = (pl.cdiv(B, tb_eff),)

    out = pl.pallas_call(
        _mf_dot_kernel,
        out_shape=jax.ShapeDtypeStruct((1, B), jnp.float32),
        grid_spec=pltpu.PrefetchScalarGridSpec(
            num_scalar_prefetch=0,
            grid=grid,
            in_specs=[
                pl.BlockSpec((E, tb_eff), lambda b: (0, b)),
                pl.BlockSpec((E, tb_eff), lambda b: (0, b)),
            ],
            out_specs=pl.BlockSpec((1, tb_eff), lambda b: (0, b)),
        ),
        compiler_params=pltpu.CompilerParams(
            # Batch axis is embarrassingly parallel -> megacore sharding on
            # multi-TC parts (consider CORE_PARALLEL if the profile shows a
            # single active TC on v7x).
            dimension_semantics=("parallel",),
            vmem_limit_bytes=32 * 1024 * 1024,
        ),
        cost_estimate=pl.CostEstimate(
            flops=2 * B * E,
            transcendentals=0,
            bytes_accessed=2 * B * E * itemsize + 4 * B,
        ),
    )(ut, it)
    return out[0]


def xavier_normal(key, shape, gain=1.0):
    # Matches torch.nn.init.xavier_normal_ for a 2D weight:
    # fan_out = shape[0], fan_in = shape[1]; std = gain*sqrt(2/(fan_in+fan_out))
    fan_out, fan_in = shape
    std = gain * (2.0 / (fan_in + fan_out)) ** 0.5
    return std * jax.random.normal(key, shape, dtype=jnp.float32)


def _check(num_users, num_items, emb_size, batch, key,
           table_dtype=jnp.float32, **kw):
    k1, k2, k3, k4 = jax.random.split(key, 4)
    user_w = xavier_normal(k1, (num_users, emb_size)).astype(table_dtype)
    item_w = xavier_normal(k2, (num_items, emb_size)).astype(table_dtype)
    user = jax.random.randint(k3, (batch,), 0, num_users, dtype=jnp.int32)
    item = jax.random.randint(k4, (batch,), 0, num_items, dtype=jnp.int32)

    # Tables stored pre-transposed (E, N): one-time layout choice at parameter
    # setup, so the per-call forward path has no transpose.
    user_w_t = jnp.transpose(user_w)
    item_w_t = jnp.transpose(item_w)

    scores = mf_forward_t(user_w_t, item_w_t, user, item, **kw)
    scores = jax.block_until_ready(scores)

    # Pure-JAX reference of the PyTorch forward() semantics (same table dtype,
    # f32 accumulation to match the kernel's upcast-then-accumulate).
    ref = jnp.sum(user_w[user].astype(jnp.float32)
                  * item_w[item].astype(jnp.float32), axis=-1)
    assert scores.shape == (batch,) and scores.dtype == jnp.float32
    assert jnp.allclose(scores, ref, atol=1e-5, rtol=1e-5), (
        float(jnp.max(jnp.abs(scores - ref))))


if __name__ == "__main__":
    key = jax.random.PRNGKey(0)
    ka, kb, kc = jax.random.split(key, 3)

    # Small, module-consistent shapes (single full-extent block; batch < 128).
    _check(num_users=16, num_items=24, emb_size=32, batch=8, key=ka)

    # Module-default emb_size=100, batch > 128 with an explicit small tile to
    # exercise a multi-step "parallel" grid plus the masked ragged tail block.
    _check(num_users=50, num_items=40, emb_size=100, batch=300, key=kb, tb=128)

    # bf16-stored tables (halves HBM traffic); kernel upcasts and accumulates
    # in f32, default (large, auto-clamped) batch tile.
    _check(num_users=50, num_items=40, emb_size=100, batch=300, key=kc,
           table_dtype=jnp.bfloat16)

    print("KERNEL_OK")
</pallas_src>

<mosaic_0001>
module attributes {stable_mosaic.version = 11 : i64} {
  func.func @_mf_dot_kernel(%arg0: i32, %arg1: memref<32x8xf32, #tpu.memory_space<vmem>>, %arg2: memref<32x8xf32, #tpu.memory_space<vmem>>, %arg3: memref<1x8xf32, #tpu.memory_space<vmem>>) attributes {dimension_semantics = [#tpu.dimension_semantics<parallel>], iteration_bounds = array<i64: 1>, scalar_prefetch = 0 : i64, scratch_operands = 0 : i64, tpu.core_type = #tpu.core_type<tc>, window_params = [{transform_indices = @transform_0, window_bounds = array<i64: 32, 8>}, {transform_indices = @transform_1, window_bounds = array<i64: 32, 8>}, {transform_indices = @transform_2, window_bounds = array<i64: 1, 8>}]} {
    %c0 = arith.constant 0 : index
    %c0_0 = arith.constant 0 : index
    %0 = vector.load %arg1[%c0, %c0_0] : memref<32x8xf32, #tpu.memory_space<vmem>>, vector<32x8xf32>
    %c0_1 = arith.constant 0 : index
    %c0_2 = arith.constant 0 : index
    %1 = vector.load %arg2[%c0_1, %c0_2] : memref<32x8xf32, #tpu.memory_space<vmem>>, vector<32x8xf32>
    %2 = arith.mulf %0, %1 : vector<32x8xf32>
    %cst = arith.constant dense<0.000000e+00> : vector<8xf32>
    %3 = vector.multi_reduction <add>, %2, %cst [0] : vector<32x8xf32> to vector<8xf32>
    %4 = vector.shape_cast %3 : vector<8xf32> to vector<1x8xf32>
    %c0_3 = arith.constant 0 : index
    %c0_4 = arith.constant 0 : index
    %5 = vector.load %arg3[%c0_3, %c0_4] : memref<1x8xf32, #tpu.memory_space<vmem>>, vector<1x8xf32>
    tpu.vector_store %arg3[%c0_3, %c0_4], %4 {strides = array<i32>} : memref<1x8xf32, #tpu.memory_space<vmem>>, vector<1x8xf32>,
    return
  }
  func.func @transform_0(%arg0: i32) -> (i32, i32) {
    %c0_i32 = arith.constant 0 : i32
    %c0_i32_0 = arith.constant 0 : i32
    return %c0_i32, %arg0 : i32, i32
  }
  func.func @transform_1(%arg0: i32) -> (i32, i32) {
    %c0_i32 = arith.constant 0 : i32
    %c0_i32_0 = arith.constant 0 : i32
    return %c0_i32, %arg0 : i32, i32
  }
  func.func @transform_2(%arg0: i32) -> (i32, i32) {
    %c0_i32 = arith.constant 0 : i32
    %c0_i32_0 = arith.constant 0 : i32
    return %c0_i32, %arg0 : i32, i32
  }
}

</mosaic_0001>

<bundles_post_ra>
// kernel: tpu_custom_call.1
= control target key start
LH: loop header
LB: loop body
LE: loop exit
PB: predicated region body
PF: predicated region fallthrough
CT: control target
= control target key end

     0   :  { %vm24_vm0 = vcmask 64512   ;;  %s126_s0 = inlined_call_operand.vmem [shape: f32[32,8], index: 0, kind: input, shape index: {}]   ;;  %s127_s1 = inlined_call_operand.vmem [shape: f32[32,8], index: 1, kind: input, shape index: {}]   ;;  %s128_s2 = inlined_call_operand.hbm [shape: f32[1,8], index: 2, kind: output, shape index: {}]  }
   0x1   :  { %v12_v0 = vld [vmem:[%s126_s0] sm:$0xff]  ;;  %v13_v1 = vld [vmem:[%s126_s0 + $0x8] sm:$0xff]  ;;  %v14_v2 = vld [vmem:[%s126_s0 + $0x10] sm:$0xff] }
   0x2   :  { %v15_v3 = vld [vmem:[%s126_s0 + $0x18] sm:$0xff]  ;;  %v16_v4 = vld [vmem:[%s127_s1] sm:$0xff]  ;;  %v17_v5 = vld [vmem:[%s127_s1 + $0x8] sm:$0xff] }
   0x3   :  { %v18_v6 = vld [vmem:[%s127_s1 + $0x10] sm:$0xff]  ;;  %v19_v7 = vld [vmem:[%s127_s1 + $0x18] sm:$0xff]  ;;  %v20_v8 = vmul.f32 %v16_v4, %v12_v0  ;;  %v21_v9 = vmul.f32 %v17_v5, %v13_v1 }
   0x4   :  { %7 = vsyncpa [#allocation3], 0  ;;  %v22_v10 = vmul.f32 %v18_v6, %v14_v2  ;;  %v23_v11 = vmul.f32 %v19_v7, %v15_v3  ;;  %s83_s0 = smov [#allocation2]   ;;  %s47_s27 = sshll.u32 %s128_s2, 4  ;;  %vm38_vm1 = vcmask 57344   ;;  %s48_s27 = int_to_ptr.hbm [resolvable:$true] %s47_s27 }
   0x5   :  { %v25_v12 = vsel %vm24_vm0, %v20_v8, 0.0  ;;  %v26_v13 = vsel %vm24_vm0, %v21_v9, 0.0  ;;  %s45_s25 = sshll.u32 %s83_s0, 4  ;;  %s46_s25 = int_to_ptr.vmem [resolvable:$true] %s45_s25 }
   0x6   :  { %v27_v14 = vadd.f32 %v26_v13, %v25_v12  ;;  %v28_v15 = vsel %vm24_vm0, %v22_v10, 0.0  ;;  %v30_v16 = vsel %vm24_vm0, %v23_v11, 0.0 }
   0x8   :  { %v29_v17 = vadd.f32 %v28_v15, %v27_v14 }
   0xa   :  { %v31_v18 = vadd.f32 %v30_v16, %v29_v17 }
   0xc   :  { %v32_v19 = vrot.slane %v31_v18, 4 }
   0xe   :  { %v33_v20 = vadd.f32 %v32_v19, %v31_v18 }
  0x10   :  { %v34_v21 = vrot.slane %v33_v20, 2 }
  0x12   :  { %v35_v22 = vadd.f32 %v34_v21, %v33_v20 }
  0x14   :  { %v36_v23 = vrot.slane %v35_v22, 1 }
  0x16   :  { %v37_v24 = vadd.f32 %v36_v23, %v35_v22 }
  0x18   :  { %39 = vst.msk [vmem:[#allocation2] sm:$0x1] %vm38_vm1, %v37_v24 }
  0x19   :  { %50 = dma.vmem_to_hbm [thread:$0]  %s46_s25, 16, %s48_s27, [#allocation3]  }
  0x1a   :  { %81 = dma.done.wait [#allocation3], 16  }
  0x1b   :  { %82 = vsyncadd [#allocation3], 4294967280 }
  0x1c   :  { %55 = vsyncpa [#allocation3], 1 }

</bundles_post_ra>
